<compile_context>
chip_gen: v5e
topology: v5e:2x2
jax: 0.10.0
libtpu: 0.0.40
codegen_flags: <defaults>
</compile_context>

<pallas_src>
import functools

import jax
import jax.numpy as jnp
from jax.experimental import pallas as pl
from jax.experimental.pallas import tpu as pltpu


def _round_up(x, m):
    return (x + m - 1) // m * m


def _gat_flash_kernel(hq_ref, hk_ref, g_ref, b_ref, o_ref,
                      m_sc, l_sc, acc_sc, *, n_real, tile, compute_dtype):
    # hq_ref : [1, T, Dp]   query-tile of h
    # hk_ref : [1, T, Dp]   key/value-tile of h
    # g_ref  : [T, T]       graph tile
    # b_ref  : [1, Dp]      bias (zero padded)
    # o_ref  : [1, T, Dp]   output tile (resident across the kv axis)
    # m_sc/l_sc : [T, 1]    running max / running sum (f32)
    # acc_sc    : [T, Dp]   running weighted sum of values (f32)
    kv = pl.program_id(2)

    @pl.when(kv == 0)
    def _():
        m_sc[...] = jnp.full(m_sc.shape, -jnp.inf, dtype=m_sc.dtype)
        l_sc[...] = jnp.zeros(l_sc.shape, dtype=l_sc.dtype)
        acc_sc[...] = jnp.zeros(acc_sc.shape, dtype=acc_sc.dtype)

    q = hq_ref[0].astype(compute_dtype)          # [T, Dp]
    k = hk_ref[0].astype(compute_dtype)          # [T, Dp]

    # scores = q @ k^T without materializing a transpose: contract last dims.
    s = jax.lax.dot_general(
        q, k, dimension_numbers=(((1,), (1,)), ((), ())),
        preferred_element_type=jnp.float32)      # [T, T], f32 accumulation

    # torch: (h h^T) * graph, then masked_fill_(score == 0, -1e16)
    s = s * g_ref[...].astype(jnp.float32)
    s = jnp.where(s == 0.0, jnp.float32(-1e16), s)

    # Padded key columns get -inf (not -1e16) so they contribute exp == 0 even
    # for fully-masked rows, keeping the softmax denominator identical to the
    # unpadded computation.
    key_idx = kv * tile + jax.lax.broadcasted_iota(jnp.int32, s.shape, 1)
    s = jnp.where(key_idx < n_real, s, -jnp.inf)

    # Online softmax update (statistics in f32).
    m_prev = m_sc[...]                                        # [T, 1]
    m_new = jnp.maximum(m_prev, jnp.max(s, axis=-1, keepdims=True))
    alpha = jnp.exp(m_prev - m_new)
    p = jnp.exp(s - m_new)                                    # [T, T]

    l_sc[...] = alpha * l_sc[...] + jnp.sum(p, axis=-1, keepdims=True)
    acc_sc[...] = alpha * acc_sc[...] + jnp.dot(
        p.astype(compute_dtype), k, preferred_element_type=jnp.float32)
    m_sc[...] = m_new

    @pl.when(kv == pl.num_programs(2) - 1)
    def _():
        inv_l = pl.reciprocal(l_sc[...], approx=True)         # EUP slot
        out = acc_sc[...] * inv_l + b_ref[...].astype(jnp.float32)
        o_ref[0] = out.astype(o_ref.dtype)


def graph_attention_layer(inputs, graph, W, b, *, compute_dtype=jnp.float32):
    """
    inputs: [B, N, C]  float32
    graph:  [N, N]     float32
    W:      [D, C]     float32  (torch nn.Linear weight layout)
    b:      [D]        float32
    returns [B, N, D]
    """
    B, N, C = inputs.shape
    D = W.shape[0]

    # Projection hoisted to XLA: one dense GEMM, reused by every tile.
    h = jnp.einsum("bnc,dc->bnd", inputs, W).astype(jnp.float32)   # [B, N, D]

    # Lane-align D, pick a query/key tile T and pad N to a multiple of it.
    Dp = _round_up(D, 128)
    T = min(256, _round_up(N, 8))
    N_pad = _round_up(N, T)

    h_pad = jnp.pad(h, ((0, 0), (0, N_pad - N), (0, Dp - D)))
    g_pad = jnp.pad(graph.astype(jnp.float32),
                    ((0, N_pad - N), (0, N_pad - N)))
    b_pad = jnp.pad(b.astype(jnp.float32), (0, Dp - D)).reshape(1, Dp)

    kernel = functools.partial(
        _gat_flash_kernel, n_real=N, tile=T, compute_dtype=compute_dtype)

    out_pad = pl.pallas_call(
        kernel,
        out_shape=jax.ShapeDtypeStruct((B, N_pad, Dp), inputs.dtype),
        grid_spec=pltpu.PrefetchScalarGridSpec(
            num_scalar_prefetch=0,
            grid=(B, N_pad // T, N_pad // T),
            in_specs=[
                pl.BlockSpec((1, T, Dp), lambda bi, qi, ki: (bi, qi, 0)),  # h (queries)
                pl.BlockSpec((1, T, Dp), lambda bi, qi, ki: (bi, ki, 0)),  # h (keys/values)
                pl.BlockSpec((T, T), lambda bi, qi, ki: (qi, ki)),         # graph tile
                pl.BlockSpec((1, Dp), lambda bi, qi, ki: (0, 0)),          # bias
            ],
            out_specs=pl.BlockSpec((1, T, Dp), lambda bi, qi, ki: (bi, qi, 0)),
            scratch_shapes=[
                pltpu.VMEM((T, 1), jnp.float32),    # running max
                pltpu.VMEM((T, 1), jnp.float32),    # running sum
                pltpu.VMEM((T, Dp), jnp.float32),   # output accumulator
            ],
        ),
        compiler_params=pltpu.CompilerParams(
            dimension_semantics=("parallel", "parallel", "arbitrary"),
        ),
    )(h_pad, h_pad, g_pad, b_pad)

    return out_pad[:, :N, :D].astype(inputs.dtype)


def reference(inputs, graph, W, b):
    # Pure-JAX reference mirroring the torch module.
    h = jnp.einsum("bnc,dc->bnd", inputs, W)
    s = jnp.einsum("bnd,bmd->bnm", h, h) * graph[None]
    s = jnp.where(s == 0.0, -1e16, s)
    attn = jax.nn.softmax(s, axis=2)
    return jnp.einsum("bnm,bmd->bnd", attn, h) + b


if __name__ == "__main__":
    B, N, in_c, out_c = 2, 8, 4, 32

    key = jax.random.PRNGKey(0)
    k_x, k_g, k_w, k_b = jax.random.split(key, 4)

    inputs = jax.random.normal(k_x, (B, N, in_c), dtype=jnp.float32)
    # Symmetric 0/1 adjacency with self loops.
    g_raw = jax.random.uniform(k_g, (N, N))
    graph = (g_raw + g_raw.T > 1.0).astype(jnp.float32)
    graph = jnp.maximum(graph, jnp.eye(N, dtype=jnp.float32))

    # nn.init.normal_ on W ([out_c, in_c]) and b ([out_c]).
    W = jax.random.normal(k_w, (out_c, in_c), dtype=jnp.float32)
    b = jax.random.normal(k_b, (out_c,), dtype=jnp.float32)

    out = jax.jit(graph_attention_layer)(inputs, graph, W, b)
    jax.block_until_ready(out)

    ref = reference(inputs, graph, W, b)
    assert out.shape == (B, N, out_c)
    # Tolerance covers the approximate (EUP) reciprocal in the softmax
    # normalization; everything else accumulates in f32.
    assert jnp.allclose(out, ref, rtol=5e-3, atol=5e-3), "mismatch vs reference"

    print("KERNEL_OK")
</pallas_src>

<mosaic_0001>
module attributes {stable_mosaic.version = 11 : i64} {
  func.func @_gat_flash_kernel(%arg0: i32, %arg1: i32, %arg2: i32, %arg3: memref<1x8x128xf32, #tpu.memory_space<vmem>>, %arg4: memref<1x8x128xf32, #tpu.memory_space<vmem>>, %arg5: memref<8x8xf32, #tpu.memory_space<vmem>>, %arg6: memref<1x128xf32, #tpu.memory_space<vmem>>, %arg7: memref<1x8x128xf32, #tpu.memory_space<vmem>>, %arg8: memref<8x1xf32, #tpu.memory_space<vmem>>, %arg9: memref<8x1xf32, #tpu.memory_space<vmem>>, %arg10: memref<8x128xf32, #tpu.memory_space<vmem>>) attributes {dimension_semantics = [#tpu.dimension_semantics<parallel>, #tpu.dimension_semantics<parallel>, #tpu.dimension_semantics<arbitrary>], iteration_bounds = array<i64: 2, 1, 1>, scalar_prefetch = 0 : i64, scratch_operands = 3 : i64, tpu.core_type = #tpu.core_type<tc>, window_params = [{transform_indices = @transform_0, window_bounds = array<i64: 1, 8, 128>}, {transform_indices = @transform_1, window_bounds = array<i64: 1, 8, 128>}, {transform_indices = @transform_2, window_bounds = array<i64: 8, 8>}, {pipeline_mode = #tpu.pipeline_mode<synchronous>, transform_indices = @transform_3, window_bounds = array<i64: 1, 128>}, {transform_indices = @transform_4, window_bounds = array<i64: 1, 8, 128>}]} {
    %c0_i32 = arith.constant 0 : i32
    %0 = arith.cmpi eq, %arg2, %c0_i32 : i32
    %1 = arith.extui %0 : i1 to i32
    %c0_i32_0 = arith.constant 0 : i32
    %2 = arith.cmpi ne, %1, %c0_i32_0 : i32
    scf.if %2 {
      %cst_29 = arith.constant 0xFF800000 : f32
      %47 = vector.broadcast %cst_29 : f32 to vector<8x1xf32>
      %c0_30 = arith.constant 0 : index
      %c0_31 = arith.constant 0 : index
      %48 = vector.load %arg8[%c0_30, %c0_31] : memref<8x1xf32, #tpu.memory_space<vmem>>, vector<8x1xf32>
      tpu.vector_store %arg8[%c0_30, %c0_31], %47 {strides = array<i32>} : memref<8x1xf32, #tpu.memory_space<vmem>>, vector<8x1xf32>,
      %cst_32 = arith.constant 0.000000e+00 : f32
      %49 = vector.broadcast %cst_32 : f32 to vector<8x1xf32>
      %c0_33 = arith.constant 0 : index
      %c0_34 = arith.constant 0 : index
      %50 = vector.load %arg9[%c0_33, %c0_34] : memref<8x1xf32, #tpu.memory_space<vmem>>, vector<8x1xf32>
      tpu.vector_store %arg9[%c0_33, %c0_34], %49 {strides = array<i32>} : memref<8x1xf32, #tpu.memory_space<vmem>>, vector<8x1xf32>,
      %cst_35 = arith.constant 0.000000e+00 : f32
      %51 = vector.broadcast %cst_35 : f32 to vector<8x128xf32>
      %c0_36 = arith.constant 0 : index
      %c0_37 = arith.constant 0 : index
      %52 = vector.load %arg10[%c0_36, %c0_37] : memref<8x128xf32, #tpu.memory_space<vmem>>, vector<8x128xf32>
      tpu.vector_store %arg10[%c0_36, %c0_37], %51 {strides = array<i32>} : memref<8x128xf32, #tpu.memory_space<vmem>>, vector<8x128xf32>,
    } else {
    }
    %c0 = arith.constant 0 : index
    %c0_1 = arith.constant 0 : index
    %c0_2 = arith.constant 0 : index
    %3 = vector.load %arg3[%c0, %c0_1, %c0_2] : memref<1x8x128xf32, #tpu.memory_space<vmem>>, vector<1x8x128xf32>
    %4 = vector.shape_cast %3 : vector<1x8x128xf32> to vector<8x128xf32>
    %c0_3 = arith.constant 0 : index
    %c0_4 = arith.constant 0 : index
    %c0_5 = arith.constant 0 : index
    %5 = vector.load %arg4[%c0_3, %c0_4, %c0_5] : memref<1x8x128xf32, #tpu.memory_space<vmem>>, vector<1x8x128xf32>
    %6 = vector.shape_cast %5 : vector<1x8x128xf32> to vector<8x128xf32>
    %cst = arith.constant dense<0.000000e+00> : vector<8x8xf32>
    %7 = tpu.matmul %4, %6, %cst {dimension_numbers = #tpu.dot_dimension_numbers<[1], [1], [0], [0], [0, 0, 1, 0], [], []>} : vector<8x128xf32>, vector<8x128xf32>, vector<8x8xf32> -> vector<8x8xf32>
    %c0_6 = arith.constant 0 : index
    %c0_7 = arith.constant 0 : index
    %8 = vector.load %arg5[%c0_6, %c0_7] : memref<8x8xf32, #tpu.memory_space<vmem>>, vector<8x8xf32>
    %9 = arith.mulf %7, %8 : vector<8x8xf32>
    %cst_8 = arith.constant 0.000000e+00 : f32
    %10 = vector.broadcast %cst_8 : f32 to vector<8x8xf32>
    %11 = arith.cmpf oeq, %9, %10 : vector<8x8xf32>
    %cst_9 = arith.constant -1.000000e+16 : f32
    %12 = vector.broadcast %cst_9 : f32 to vector<8x8xf32>
    %13 = arith.select %11, %12, %9 : vector<8x8xi1>, vector<8x8xf32>
    %c8_i32 = arith.constant 8 : i32
    %14 = arith.muli %arg2, %c8_i32 : i32
    %15 = tpu.iota {dimensions = array<i32: 1>} : vector<8x8xi32>
    %16 = vector.broadcast %14 : i32 to vector<8x8xi32>
    %17 = arith.addi %16, %15 : vector<8x8xi32>
    %c8_i32_10 = arith.constant 8 : i32
    %18 = vector.broadcast %c8_i32_10 : i32 to vector<8x8xi32>
    %19 = arith.cmpi slt, %17, %18 : vector<8x8xi32>
    %cst_11 = arith.constant 0xFF800000 : f32
    %20 = vector.broadcast %cst_11 : f32 to vector<8x8xf32>
    %21 = arith.select %19, %13, %20 : vector<8x8xi1>, vector<8x8xf32>
    %c0_12 = arith.constant 0 : index
    %c0_13 = arith.constant 0 : index
    %22 = vector.load %arg8[%c0_12, %c0_13] : memref<8x1xf32, #tpu.memory_space<vmem>>, vector<8x1xf32>
    %cst_14 = arith.constant dense<0xFF800000> : vector<8xf32>
    %23 = vector.multi_reduction <maximumf>, %21, %cst_14 [1] : vector<8x8xf32> to vector<8xf32>
    %24 = vector.shape_cast %23 : vector<8xf32> to vector<8x1xf32>
    %25 = arith.maximumf %22, %24 : vector<8x1xf32>
    %26 = arith.subf %22, %25 : vector<8x1xf32>
    %27 = math.exp %26 : vector<8x1xf32>
    %28 = vector.broadcast %25 : vector<8x1xf32> to vector<8x8xf32>
    %29 = arith.subf %21, %28 : vector<8x8xf32>
    %30 = math.exp %29 : vector<8x8xf32>
    %c0_15 = arith.constant 0 : index
    %c0_16 = arith.constant 0 : index
    %31 = vector.load %arg9[%c0_15, %c0_16] : memref<8x1xf32, #tpu.memory_space<vmem>>, vector<8x1xf32>
    %32 = arith.mulf %27, %31 : vector<8x1xf32>
    %cst_17 = arith.constant dense<0.000000e+00> : vector<8xf32>
    %33 = vector.multi_reduction <add>, %30, %cst_17 [1] : vector<8x8xf32> to vector<8xf32>
    %34 = vector.shape_cast %33 : vector<8xf32> to vector<8x1xf32>
    %35 = arith.addf %32, %34 : vector<8x1xf32>
    %c0_18 = arith.constant 0 : index
    %c0_19 = arith.constant 0 : index
    %36 = vector.load %arg9[%c0_18, %c0_19] : memref<8x1xf32, #tpu.memory_space<vmem>>, vector<8x1xf32>
    tpu.vector_store %arg9[%c0_18, %c0_19], %35 {strides = array<i32>} : memref<8x1xf32, #tpu.memory_space<vmem>>, vector<8x1xf32>,
    %c0_20 = arith.constant 0 : index
    %c0_21 = arith.constant 0 : index
    %37 = vector.load %arg10[%c0_20, %c0_21] : memref<8x128xf32, #tpu.memory_space<vmem>>, vector<8x128xf32>
    %38 = vector.broadcast %27 : vector<8x1xf32> to vector<8x128xf32>
    %39 = arith.mulf %38, %37 : vector<8x128xf32>
    %cst_22 = arith.constant dense<0.000000e+00> : vector<8x128xf32>
    %40 = tpu.matmul %30, %6, %cst_22 {dimension_numbers = #tpu.dot_dimension_numbers<[1], [0], [0], [1], [0, 0, 1, 1], [], []>} : vector<8x8xf32>, vector<8x128xf32>, vector<8x128xf32> -> vector<8x128xf32>
    %41 = arith.addf %39, %40 : vector<8x128xf32>
    %c0_23 = arith.constant 0 : index
    %c0_24 = arith.constant 0 : index
    %42 = vector.load %arg10[%c0_23, %c0_24] : memref<8x128xf32, #tpu.memory_space<vmem>>, vector<8x128xf32>
    tpu.vector_store %arg10[%c0_23, %c0_24], %41 {strides = array<i32>} : memref<8x128xf32, #tpu.memory_space<vmem>>, vector<8x128xf32>,
    %c0_25 = arith.constant 0 : index
    %c0_26 = arith.constant 0 : index
    %43 = vector.load %arg8[%c0_25, %c0_26] : memref<8x1xf32, #tpu.memory_space<vmem>>, vector<8x1xf32>
    tpu.vector_store %arg8[%c0_25, %c0_26], %25 {strides = array<i32>} : memref<8x1xf32, #tpu.memory_space<vmem>>, vector<8x1xf32>,
    %c0_i32_27 = arith.constant 0 : i32
    %44 = arith.cmpi eq, %arg2, %c0_i32_27 : i32
    %45 = arith.extui %44 : i1 to i32
    %c0_i32_28 = arith.constant 0 : i32
    %46 = arith.cmpi ne, %45, %c0_i32_28 : i32
    scf.if %46 {
      %c0_29 = arith.constant 0 : index
      %c0_30 = arith.constant 0 : index
      %47 = vector.load %arg9[%c0_29, %c0_30] : memref<8x1xf32, #tpu.memory_space<vmem>>, vector<8x1xf32>
      %48 = tpu.reciprocal %47 {approx = true} : vector<8x1xf32> -> vector<8x1xf32>
      %c0_31 = arith.constant 0 : index
      %c0_32 = arith.constant 0 : index
      %49 = vector.load %arg10[%c0_31, %c0_32] : memref<8x128xf32, #tpu.memory_space<vmem>>, vector<8x128xf32>
      %50 = vector.broadcast %48 : vector<8x1xf32> to vector<8x128xf32>
      %51 = arith.mulf %49, %50 : vector<8x128xf32>
      %c0_33 = arith.constant 0 : index
      %c0_34 = arith.constant 0 : index
      %52 = vector.load %arg6[%c0_33, %c0_34] : memref<1x128xf32, #tpu.memory_space<vmem>>, vector<1x128xf32>
      %53 = vector.broadcast %52 : vector<1x128xf32> to vector<8x128xf32>
      %54 = arith.addf %51, %53 : vector<8x128xf32>
      %c0_35 = arith.constant 0 : index
      %c0_36 = arith.constant 0 : index
      %c0_37 = arith.constant 0 : index
      %55 = vector.load %arg7[%c0_35, %c0_36, %c0_37] : memref<1x8x128xf32, #tpu.memory_space<vmem>>, vector<1x8x128xf32>
      %56 = vector.shape_cast %55 : vector<1x8x128xf32> to vector<8x128xf32>
      %57 = vector.shape_cast %54 : vector<8x128xf32> to vector<1x8x128xf32>
      tpu.vector_store %arg7[%c0_35, %c0_36, %c0_37], %57 {strides = array<i32>} : memref<1x8x128xf32, #tpu.memory_space<vmem>>, vector<1x8x128xf32>,
    } else {
    }
    return
  }
  func.func @transform_0(%arg0: i32, %arg1: i32, %arg2: i32) -> (i32, i32, i32) {
    %c0_i32 = arith.constant 0 : i32
    %c0_i32_0 = arith.constant 0 : i32
    return %arg0, %arg1, %c0_i32 : i32, i32, i32
  }
  func.func @transform_1(%arg0: i32, %arg1: i32, %arg2: i32) -> (i32, i32, i32) {
    %c0_i32 = arith.constant 0 : i32
    %c0_i32_0 = arith.constant 0 : i32
    return %arg0, %arg2, %c0_i32 : i32, i32, i32
  }
  func.func @transform_2(%arg0: i32, %arg1: i32, %arg2: i32) -> (i32, i32) {
    %c0_i32 = arith.constant 0 : i32
    return %arg1, %arg2 : i32, i32
  }
  func.func @transform_3(%arg0: i32, %arg1: i32, %arg2: i32) -> (i32, i32) {
    %c0_i32 = arith.constant 0 : i32
    %c0_i32_0 = arith.constant 0 : i32
    %c0_i32_1 = arith.constant 0 : i32
    return %c0_i32, %c0_i32_0 : i32, i32
  }
  func.func @transform_4(%arg0: i32, %arg1: i32, %arg2: i32) -> (i32, i32, i32) {
    %c0_i32 = arith.constant 0 : i32
    %c0_i32_0 = arith.constant 0 : i32
    return %arg0, %arg1, %c0_i32 : i32, i32, i32
  }
}

</mosaic_0001>

<bundles_post_ra>
// kernel: graph_attention_layer.1
= control target key start
LH: loop header
LB: loop body
LE: loop exit
PB: predicated region body
PF: predicated region fallthrough
CT: control target
= control target key end

     0   :  { %9 = vsyncpa [#allocation6], 0  ;;  %s825_s0 = inlined_call_operand.vmem [shape: f32[2,8,128], index: 0, kind: input, shape index: {}, may-alias: {0,1}]   ;;  %s826_s1 = inlined_call_operand.vmem [shape: f32[2,8,128], index: 1, kind: input, shape index: {}, may-alias: {0,1}]   ;;  %s827_s2 = inlined_call_operand.vmem [shape: f32[8,8], index: 2, kind: input, shape index: {}]   ;;  %s828_s3 = inlined_call_operand.vmem [shape: f32[1,128], index: 3, kind: input, shape index: {}]   ;;  %s829_s4 = inlined_call_operand.hbm [shape: f32[2,8,128], index: 4, kind: output, shape index: {}]  }
   0x1   :  { %11 = vsyncpa [#allocation6 + $0x1], 0  ;;  %s712_s15 = smov 0   ;;  %s714_s16 = smov 0  }
   0x2   :  { %s716_s17 = smov 0   ;;  %s718_s18 = smov 0  }
   0x3   :  { %s720_s19 = smov 0   ;;  %s722_s20 = smov 0  }
   0x4 LB: > { %s522_s21 = sadd.s32 4294967295, %s682_s20   ;;  %s523_s22 = sadd.s32 4294967294, %s682_s20   ;;  %s682_s20 = sphi %s722_s20, %s17_s20   ;;  %s678_s19 = sphi %s720_s19, %s836_s19   ;;  %s674_s18 = sphi %s718_s18, %s835_s18   ;;  %s670_s17 = sphi %s716_s17, %s834_s17   ;;  %s666_s16 = sphi %s714_s16, %s833_s16   ;;  %s662_s15 = sphi %s712_s15, %s832_s15  }
   0x5   : > { %s36_s23 = sadd.s32 1, %s678_s19  ;;  %s150_s24 = sadd.s32 1, %s670_s17 }
   0x6   : > { %p38_p0 = scmp.ge.s32.totalorder %s36_s23, 2  ;;  %p160_p1 = scmp.ne.s32.totalorder %s670_s17, %s666_s16 }
   0x7   : > { %p161_p2 = scmp.eq.s32.totalorder %s522_s21, 1  ;;  %p166_p3 = scmp.ne.s32.totalorder %s666_s16, %s662_s15 }
   0x8   : > { %s838_s23 = smov (%p38_p0, %s36_s23), 0  ;;  %p167_p5 = scmp.eq.s32.totalorder %s523_s22, 1 }
   0x9   : > { %p752_p4 = por %p161_p2, %p160_p1  ;;  %s145_s26 = ssub.s32 %s678_s19, %s838_s23 }
   0xa   : > { %p527_p6 = scmp.ge.s32.totalorder %s682_s20, 1  ;;  %p148_p7 = scmp.eq.s32.totalorder %s145_s26, 0 }
   0xb   : > { %p759_p8 = por %p167_p5, %p166_p3  ;;  %p218_p9 = scmp.lt.s32.totalorder %s682_s20, 3 }
   0xc   : > { %s765_s28 = scalar_select %p148_p7, %s670_s17, %s150_s24  }
   0xd   : > { %p219_p10 = pnand %p527_p6, %p218_p9 }
   0xe   : > { %p260_p11 = scmp.lt.s32.totalorder (!%p219_p10), %s674_s18, 1  ;;  %s257_s13 = sand.u32 (!%p219_p10), 1, %s666_s16  }
   0xf   : > { %222 = sbr.rel (%p219_p10) target bundleno = 636 (0x27c), region = 36  ;;  %s528_s14 = sshll.u32 (!%p219_p10), %s257_s13, 3 }
  0x10   : > { %s533_s21 = sshll.u32 (!%p219_p10), %s674_s18, 3  ;;  %s259_s5 = scalar_lea.vmem (!%p219_p10), [#allocation5], %s528_s14 }
  0x11   : > { %s410_s26 = scalar_lea.hbm (!%p219_p10), %s829_s4, %s533_s21  ;;  %s412_s6 = sshll.u32 (!%p219_p10), %s259_s5, 4  ;;  %s413_s6 = int_to_ptr.vmem [resolvable:$true] %s412_s6 }
  0x12   : > { %s624_s12 = scalar_lea.hbm (!%p219_p10), %s829_s4, 16 }
  0x14   : > { %s261_s29 = scalar_select %p260_p11, %s674_s18, 1  ;;  %vm285_vm0 = vcmask 7168   ;;  %v684_v2 = vmov -inf   ;;  %v316_v3 = vlaneseq  ;;  %v311_v4 = vld [vmem:[%s827_s2] sm:$0xff]  ;;  %vm323_vm3 = vcmask 64512  }
  0x15   : > { %286 = vst.msk [vmem:[#allocation2] sm:$0xff] %vm285_vm0, %v684_v2  ;;  %v685_v11 = vmov 0   ;;  %v686_v12 = vmov 0.0   ;;  %v597_v34 = vld [vmem:[%s828_s3] ss:$0 sm:$0xff]  ;;  %s399_s18 = scalar_lea.sflag [#allocation6], %s257_s13 }
  0x16   : > { %s529_s30 = sshll.u32 %s261_s29, 3  ;;  %v317_v5 = vand.u32 127, %v316_v3  ;;  %594 = vset.pattern.permute.xlu0 %v685_v11  ;;  %595 = vset.pattern.permute.xlu1 %v685_v11  ;;  %287 = vst.msk [vmem:[#allocation3] sm:$0xff] %vm285_vm0, %v686_v12 }
  0x17   : > { %s273_s7 = scalar_lea.vmem %s826_s1, %s529_s30  ;;  %s266_s10 = scalar_lea.vmem %s825_s0, %s529_s30  ;;  %596 = vset.pattern.permute.xlu2 %v685_v11 }
  0x18   : > { %v290_v0 = vld [vmem:[%s273_s7] sm:$0xff]  ;;  %vm320_vm1 = vcmp.lt.s32.totalorder %v317_v5, 8  ;;  %s414_s7 = sshll.u32 %s410_s26, 4  ;;  %s415_s7 = int_to_ptr.hbm [resolvable:$true] %s414_s7 }
  0x19   : > { %306 = vmatpush.xpose.msra.mxu0 %v290_v0  ;;  %v289_v1 = vld [vmem:[%s266_s10] sm:$0xff]  ;;  %372 = vmatpush.msra.mxu1 %v290_v0  ;;  %s618_s8 = sshra.s32 %s415_s7, 4  ;;  %s619_s8 = int_to_ptr.hbm [resolvable:$true] %s618_s8 }
  0x1a   : > { %s620_s9 = scalar_lea.hbm %s619_s8, 8  ;;  %p625_p1 = scmp.lt.s32.totalorder %s619_s8, %s829_s4 }
  0x1b   : > { %p621_p12 = scmp.ne.s32.totalorder %s619_s8, %s620_s9  ;;  %p626_p2 = scmp.lt.s32.totalorder %s624_s12, %s620_s9 }
  0x1c   : > { %307 = vmatmul.f32.vlgmr.msra.gmra.mxu0 %v289_v1  ;;  %v322_v13 = vld [vmem:[#allocation2] sm:$0xff] }
  0x1d   : > { %v339_v24 = vld [vmem:[#allocation3] sm:$0xff]  ;;  %p622_p13 = pnand %p621_p12, %p752_p4  ;;  %p627_p3 = por %p626_p2, %p625_p1 }
  0x1f   : > { %p623_p0 = pneg %p622_p13 }
  0x21   : > { %p628_p5 = pnand %p627_p3, %p623_p0 }
  0x99   : > { %v308_v6 = vpop.f32.mrf.mxu0 }
  0x9a   : > { %v312_v7 = vmul.f32 %v311_v4, %v308_v6 }
  0x9c   : > { %vm313_vm2 = vcmp.eq.f32.partialorder %v312_v7, 0.0 }
  0x9d   : > { %v314_v8 = vsel %vm313_vm2, -1e+16, %v312_v7 }
  0x9e   : > { %v321_v9 = vsel %vm320_vm1, %v314_v8, -inf }
  0x9f   : > { %v324_v10 = vsel %vm323_vm3, %v321_v9, -inf }
  0xa0   : > { %325 = vmax.xlane.f32.xlu0 %v324_v10 }
 0x113   : > { %v326_v14 = vpop.xlane.xlu0 %325 }
 0x114   : > { %v327_v15 = vmax.f32 %v322_v13, %v326_v14 }
 0x116   : > { %v328_v16 = vsub.f32 %v322_v13, %v327_v15  ;;  %379 = vst.msk [vmem:[#allocation2] sm:$0xff] %vm285_vm0, %v327_v15  ;;  %333 = vperm.xlu0 %594, %v327_v15  }
 0x118   : > { %v329_v22 = vmul.f32 1.442695, %v328_v16 }
 0x188   : > { %v334_v17 = vpop.permute.xlu0 %333 }
 0x189   : > { %v336_v18 = vsub.f32 %v321_v9, %v334_v17 }
 0x18b   : > { %v337_v19 = vmul.f32 1.442695, %v336_v18 }
 0x18d   : > { %598 = vpow2.f32 %v337_v19 }
 0x18e   : > { %600 = vpow2.f32 %v329_v22 }
 0x193   : > { %v599_v20 = vpop.eup %598 }
 0x194   : > { %531 = vmatmul.msk.f32.vlgmr.msra.gmra.mxu1 %vm323_vm3, %v599_v20  ;;  %v341_v21 = vsel %vm323_vm3, %v599_v20, 0.0  ;;  %v601_v23 = vpop.eup %600 }
 0x195   : > { %342 = vadd.xlane.f32.xlu1 %v341_v21  ;;  %v340_v25 = vmul.f32 %v601_v23, %v339_v24 }
 0x1ae   : > { %350 = vperm.xlu1 %595, %v601_v23  }
 0x208   : > { %v343_v26 = vpop.xlane.xlu1 %342 }
 0x209   : > { %v344_v27 = vadd.f32 %v343_v26, %v340_v25 }
 0x20b   : > { %346 = vst.msk [vmem:[#allocation3] sm:$0xff] %vm285_vm0, %v344_v27 }
 0x211   : > { %v374_v32 = vpop.f32.mrf.mxu1 }
 0x212   : > { %v383_v28 = vld [vmem:[#allocation3] sm:$0xff] }
 0x213   : > { %602 = vrcp.f32 %v383_v28 }
 0x219   : > { %v603_v29 = vpop.eup %602 }
 0x21a   : > { %388 = vperm.xlu2 %596, %v603_v29  }
 0x220   : > { %v351_v30 = vpop.permute.xlu1 %350 }
 0x221   : > { %v353_v31 = vmul.f32 0.0, %v351_v30 }
 0x223   : > { %v377_v33 = vadd.f32 %v374_v32, %v353_v31 }
 0x274   : > { %v389_v35 = vpop.permute.xlu2 %388 }
 0x275   : > { %v391_v36 = vmul.f32 %v389_v35, %v377_v33 }
 0x277   : > { %v396_v37 = vadd.f32 %v597_v34, %v391_v36 }
 0x279   : > { %397 = vst [vmem:[%s259_s5] sm:$0xff] %v396_v37 }
 0x27a   : > { %631 = shalt.err (!%p628_p5)
}
 0x27b   : > { %536 = dma.vmem_to_hbm [thread:$0]  (%p752_p4), %s413_s6, 128, %s415_s7, %s399_s18  }
 0x27c PF: > { %p542_p6 = scmp.ge.s32.totalorder %s682_s20, 2  ;;  %s426_s13 = sand.u32 1, %s662_s15  }
 0x27d   : > { %s427_s22 = scalar_lea.sflag [#allocation6], %s426_s13 }
 0x27e   : > { %p539_p7 = pnand %p542_p6, %p759_p8 }
 0x280   : > { %p540_p9 = pneg %p539_p7 }
 0x282   : > { %657 = dma.done.wait (%p540_p9), %s427_s22, 128  }
 0x283   : > { %659 = vsyncadd (%p540_p9), %s427_s22, 4294967168  ;;  %s17_s20 = sadd.s32 1, %s682_s20   ;;  %s832_s15 = smov %s666_s16 }
 0x284   : > { %p14_p10 = scmp.ge.s32.totalorder %s17_s20, 4   ;;  %s833_s16 = smov %s670_s17 }
 0x285   : > { %s834_s17 = smov %s765_s28  ;;  %s835_s18 = smov %s678_s19 }
 0x286   : > { %s836_s19 = smov %s838_s23  ;;  %16 = sbr.rel (!%p14_p10) target bundleno = 4 (0x4), region = 85 }
 0x28b   :  { %433 = vsyncpa [#allocation6], 1 }
 0x28c   :  { %435 = vsyncpa [#allocation6 + $0x1], 1 }

</bundles_post_ra>
